<compile_context>
chip_gen: v6e
topology: v6e:2x2x1
jax: 0.10.0
libtpu: 0.0.40
codegen_flags: <defaults>
</compile_context>

<pallas_src>
import functools
import math

import jax
import jax.numpy as jnp
import numpy as np
from jax.experimental import pallas as pl
from jax.experimental.pallas import tpu as pltpu


# -----------------------------------------------------------------------------
# Kernel: one grid step processes a batch block of Bt images end-to-end.
#   x_ref  : [Bt, H, K*W*C_in]   bf16  H-padded, K-row-shift-gathered NHWC image
#   bw_ref : [K*W*C_in, W*C_mid] bf16  folded banded conv weights (W-pad baked in)
#   cb_ref : [1, W*C_mid]        f32   conv bias tiled over width
#   g_ref  : [W*C_mid, NCp]      bf16  fc weight tiled over width, classes padded
#   fb_ref : [1, NCp]            f32   fc bias; padded classes carry -1e30
#   o_ref  : [1, Bt, NCp]        f32   softmax probabilities
# -----------------------------------------------------------------------------
def fused_cnn_head_kernel(x_ref, bw_ref, cb_ref, g_ref, fb_ref, o_ref, *, inv_hw):
    bt, h, kwc = x_ref.shape
    wcm = bw_ref.shape[1]

    # Conv: single folded contraction (K taps x width x C_in deep) -> lane-dense
    # [Bt*H, W*C_mid] accumulator that never leaves VMEM/vregs.
    x2 = x_ref[...].reshape(bt * h, kwc)                                  # bf16
    acc = jnp.dot(x2, bw_ref[...], preferred_element_type=jnp.float32)
    acc = jnp.maximum(acc + cb_ref[...], 0.0)                             # bias + ReLU (f32)

    # GAP before the narrow FC: sublane-reduce over H; the width-sum is folded
    # into the width-tiled fc weight, so the FC matmul has M = Bt only.
    pooled = jnp.sum(acc.reshape(bt, h, wcm), axis=1) * inv_hw            # [Bt, W*C_mid] f32
    logits = jnp.dot(pooled.astype(g_ref.dtype), g_ref[...],
                     preferred_element_type=jnp.float32) + fb_ref[...]    # [Bt, NCp] f32

    # Numerically-stable softmax; exact division (padded classes -> exp == 0).
    m = jnp.max(logits, axis=-1, keepdims=True)
    e = jnp.exp(logits - m)
    o_ref[0] = e / jnp.sum(e, axis=-1, keepdims=True)


# -----------------------------------------------------------------------------
# One-time parameter preparation (outside the hot path).
# -----------------------------------------------------------------------------
def prepare_params(params, W):
    conv_w, conv_b, fc_w, fc_b = (np.asarray(p, np.float32) for p in params)
    C_mid, C_in, K, _ = conv_w.shape
    NC = fc_w.shape[0]
    pad = (K - 1) // 2
    NCp = 128 * math.ceil(NC / 128)                       # lane-dense class dim

    # conv_w[m, c, dh, dw] -> [dh, dw, c, m]
    w_khwc = conv_w.transpose(2, 3, 1, 0)

    # Folded banded (block-Toeplitz) weight: one [K*W*C_in, W*C_mid] slab.
    #   bw[dh*W*C_in + wi*C_in + c, w*C_mid + m] = conv_w[m, c, dh, dw],
    #   wi = w + dw - pad (out-of-range taps stay 0 -> width 'SAME' padding).
    bw = np.zeros((K * W * C_in, W * C_mid), np.float32)
    for dh in range(K):
        base = dh * W * C_in
        for w in range(W):
            for dw in range(K):
                wi = w + dw - pad
                if 0 <= wi < W:
                    bw[base + wi * C_in: base + (wi + 1) * C_in,
                       w * C_mid:(w + 1) * C_mid] = w_khwc[dh, dw]

    cb = np.tile(conv_b, W).reshape(1, W * C_mid)          # conv bias tiled over width
    g = np.zeros((W * C_mid, NCp), np.float32)             # fc weight tiled over width
    g[:, :NC] = np.tile(fc_w.T, (W, 1))
    fb = np.full((1, NCp), -1e30, np.float32)               # padded classes -> prob 0
    fb[0, :NC] = fc_b

    return (jnp.asarray(bw, jnp.bfloat16), jnp.asarray(cb),
            jnp.asarray(g, jnp.bfloat16), jnp.asarray(fb))


def _auto_block_batch(batch, h, target_rows=256):
    """Bt so the conv matmul has ~128-256 rows, while keeping >= 2 grid steps."""
    bt = max(1, min(batch, max(1, target_rows // max(h, 1))))
    while bt > 1 and (batch + bt - 1) // bt < 2:            # v7x: 2 TensorCores
        bt //= 2
    return max(bt, 1)


# -----------------------------------------------------------------------------
# Forward pass (ModelWithProcess semantics): returns softmax probabilities.
# -----------------------------------------------------------------------------
def model_with_process_forward(x_nchw, prepared, *, num_classes):
    bw, cb, g, fb = prepared
    B, C, H, W = x_nchw.shape
    KWC, WCm = bw.shape                                     # K*W*C_in, W*C_mid
    NCp = g.shape[1]
    K = KWC // (W * C)
    pad = (K - 1) // 2

    bt = _auto_block_batch(B, H)
    n_blocks = (B + bt - 1) // bt
    Bp = n_blocks * bt

    # Layout glue (one fused XLA op): NCHW -> H-padded NHWC, K-row-shift gather
    # along lanes, bf16 cast, pad batch to a multiple of Bt.
    x_nhwc = jnp.transpose(x_nchw, (0, 2, 3, 1))                        # [B, H, W, C]
    xp = jnp.pad(x_nhwc, ((0, Bp - B), (pad, pad), (0, 0), (0, 0)))     # [Bp, Hp, W, C]
    xf = xp.reshape(Bp, H + 2 * pad, W * C)
    x_sh = jnp.concatenate([xf[:, dh:dh + H, :] for dh in range(K)],
                           axis=-1).astype(jnp.bfloat16)                # [Bp, H, K*W*C]

    kernel = functools.partial(fused_cnn_head_kernel, inv_hw=1.0 / float(H * W))

    out = pl.pallas_call(
        kernel,
        out_shape=jax.ShapeDtypeStruct((n_blocks, bt, NCp), jnp.float32),
        grid_spec=pltpu.PrefetchScalarGridSpec(
            num_scalar_prefetch=0,
            grid=(n_blocks,),
            in_specs=[
                pl.BlockSpec((bt, H, KWC), lambda i: (i, 0, 0)),   # image batch block
                pl.BlockSpec((KWC, WCm), lambda i: (0, 0)),        # folded banded conv W
                pl.BlockSpec((1, WCm), lambda i: (0, 0)),          # conv bias (tiled)
                pl.BlockSpec((WCm, NCp), lambda i: (0, 0)),        # fc weight (tiled, padded)
                pl.BlockSpec((1, NCp), lambda i: (0, 0)),          # fc bias (padded)
            ],
            out_specs=pl.BlockSpec((1, bt, NCp), lambda i: (i, 0, 0)),
        ),
        compiler_params=pltpu.CompilerParams(
            dimension_semantics=("parallel",),       # shard batch blocks across TCs
            vmem_limit_bytes=32 * 1024 * 1024,
        ),
    )(x_sh, bw, cb, g, fb)

    return out.reshape(Bp, NCp)[:B, :num_classes]


# -----------------------------------------------------------------------------
# Reference (plain JAX) and synthetic parameters.
# -----------------------------------------------------------------------------
def reference_forward(x_nchw, params):
    conv_w, conv_b, fc_w, fc_b = params
    y = jax.lax.conv_general_dilated(
        x_nchw, conv_w, window_strides=(1, 1), padding="SAME",
        dimension_numbers=("NCHW", "OIHW", "NCHW"))
    y = jnp.maximum(y + conv_b[None, :, None, None], 0.0)
    pooled = jnp.mean(y, axis=(2, 3))
    logits = pooled @ fc_w.T + fc_b[None, :]
    return jax.nn.softmax(logits, axis=-1)


def make_params(C_in=4, C_mid=8, num_classes=10):
    key = jax.random.PRNGKey(0)
    k1, k2, k3, k4 = jax.random.split(key, 4)
    conv_w = 0.1 * jax.random.normal(k1, (C_mid, C_in, 3, 3), jnp.float32)
    conv_b = 0.1 * jax.random.normal(k2, (C_mid,), jnp.float32)
    fc_w = 0.1 * jax.random.normal(k3, (num_classes, C_mid), jnp.float32)
    fc_b = 0.1 * jax.random.normal(k4, (num_classes,), jnp.float32)
    return conv_w, conv_b, fc_w, fc_b


if __name__ == "__main__":
    # Batch chosen so the batched grid is exercised: Bt=16 -> conv matmul M=256,
    # 2 grid steps (both TensorCores on v7x; two full 128-row passes on v5e).
    B, C, H, W = 32, 4, 16, 16
    NUM_CLASSES = 10

    key = jax.random.PRNGKey(0)
    x = jax.random.normal(key, (B, C, H, W), jnp.float32)        # NCHW, like PyTorch

    params = make_params(C_in=C, C_mid=8, num_classes=NUM_CLASSES)
    prepared = prepare_params(params, W)                         # once, off the hot path

    fwd = jax.jit(functools.partial(model_with_process_forward,
                                    num_classes=NUM_CLASSES))
    out = jax.block_until_ready(fwd(x, prepared))

    assert out.shape == (B, NUM_CLASSES)
    # exact softmax division -> rows sum to 1 up to f32 rounding
    assert np.allclose(np.asarray(jnp.sum(out, axis=-1)), 1.0, atol=1e-4)
    # matches the plain-JAX reference of Conv->ReLU->GAP->Linear->softmax
    ref = np.asarray(reference_forward(x, params))
    assert np.allclose(np.asarray(out), ref, atol=2e-3, rtol=2e-3)

    print("KERNEL_OK")
</pallas_src>

<mosaic_0001>
module attributes {stable_mosaic.version = 11 : i64} {
  func.func @fused_cnn_head_kernel(%arg0: i32, %arg1: memref<16x16x192xbf16, #tpu.memory_space<vmem>>, %arg2: memref<192x128xbf16, #tpu.memory_space<vmem>>, %arg3: memref<1x128xf32, #tpu.memory_space<vmem>>, %arg4: memref<128x128xbf16, #tpu.memory_space<vmem>>, %arg5: memref<1x128xf32, #tpu.memory_space<vmem>>, %arg6: memref<1x16x128xf32, #tpu.memory_space<vmem>>) attributes {dimension_semantics = [#tpu.dimension_semantics<parallel>], iteration_bounds = array<i64: 2>, scalar_prefetch = 0 : i64, scratch_operands = 0 : i64, tpu.core_type = #tpu.core_type<tc>, window_params = [{transform_indices = @transform_0, window_bounds = array<i64: 16, 16, 192>}, {pipeline_mode = #tpu.pipeline_mode<synchronous>, transform_indices = @transform_1, window_bounds = array<i64: 192, 128>}, {pipeline_mode = #tpu.pipeline_mode<synchronous>, transform_indices = @transform_2, window_bounds = array<i64: 1, 128>}, {pipeline_mode = #tpu.pipeline_mode<synchronous>, transform_indices = @transform_3, window_bounds = array<i64: 128, 128>}, {pipeline_mode = #tpu.pipeline_mode<synchronous>, transform_indices = @transform_4, window_bounds = array<i64: 1, 128>}, {transform_indices = @transform_5, window_bounds = array<i64: 1, 16, 128>}]} {
    %c0 = arith.constant 0 : index
    %c0_0 = arith.constant 0 : index
    %c0_1 = arith.constant 0 : index
    %0 = vector.load %arg1[%c0, %c0_0, %c0_1] : memref<16x16x192xbf16, #tpu.memory_space<vmem>>, vector<16x16x192xbf16>
    %1 = vector.shape_cast %0 : vector<16x16x192xbf16> to vector<256x192xbf16>
    %c0_2 = arith.constant 0 : index
    %c0_3 = arith.constant 0 : index
    %2 = vector.load %arg2[%c0_2, %c0_3] : memref<192x128xbf16, #tpu.memory_space<vmem>>, vector<192x128xbf16>
    %cst = arith.constant dense<0.000000e+00> : vector<256x128xf32>
    %3 = tpu.matmul %1, %2, %cst {dimension_numbers = #tpu.dot_dimension_numbers<[1], [0], [0], [1], [0, 0, 1, 1], [], []>} : vector<256x192xbf16>, vector<192x128xbf16>, vector<256x128xf32> -> vector<256x128xf32>
    %c0_4 = arith.constant 0 : index
    %c0_5 = arith.constant 0 : index
    %4 = vector.load %arg3[%c0_4, %c0_5] : memref<1x128xf32, #tpu.memory_space<vmem>>, vector<1x128xf32>
    %5 = vector.broadcast %4 : vector<1x128xf32> to vector<256x128xf32>
    %6 = arith.addf %3, %5 : vector<256x128xf32>
    %cst_6 = arith.constant 0.000000e+00 : f32
    %7 = vector.broadcast %cst_6 : f32 to vector<256x128xf32>
    %8 = arith.maximumf %6, %7 : vector<256x128xf32>
    %9 = vector.shape_cast %8 : vector<256x128xf32> to vector<16x16x128xf32>
    %cst_7 = arith.constant dense<0.000000e+00> : vector<16x128xf32>
    %10 = vector.multi_reduction <add>, %9, %cst_7 [1] : vector<16x16x128xf32> to vector<16x128xf32>
    %cst_8 = arith.constant 3.906250e-03 : f32
    %11 = vector.broadcast %cst_8 : f32 to vector<16x128xf32>
    %12 = arith.mulf %10, %11 : vector<16x128xf32>
    %13 = arith.truncf %12 : vector<16x128xf32> to vector<16x128xbf16>
    %c0_9 = arith.constant 0 : index
    %c0_10 = arith.constant 0 : index
    %14 = vector.load %arg4[%c0_9, %c0_10] : memref<128x128xbf16, #tpu.memory_space<vmem>>, vector<128x128xbf16>
    %cst_11 = arith.constant dense<0.000000e+00> : vector<16x128xf32>
    %15 = tpu.matmul %13, %14, %cst_11 {dimension_numbers = #tpu.dot_dimension_numbers<[1], [0], [0], [1], [0, 0, 1, 1], [], []>} : vector<16x128xbf16>, vector<128x128xbf16>, vector<16x128xf32> -> vector<16x128xf32>
    %c0_12 = arith.constant 0 : index
    %c0_13 = arith.constant 0 : index
    %16 = vector.load %arg5[%c0_12, %c0_13] : memref<1x128xf32, #tpu.memory_space<vmem>>, vector<1x128xf32>
    %17 = vector.broadcast %16 : vector<1x128xf32> to vector<16x128xf32>
    %18 = arith.addf %15, %17 : vector<16x128xf32>
    %cst_14 = arith.constant dense<0xFF800000> : vector<16xf32>
    %19 = vector.multi_reduction <maximumf>, %18, %cst_14 [1] : vector<16x128xf32> to vector<16xf32>
    %20 = vector.shape_cast %19 : vector<16xf32> to vector<16x1xf32>
    %21 = vector.broadcast %20 : vector<16x1xf32> to vector<16x128xf32>
    %22 = arith.subf %18, %21 : vector<16x128xf32>
    %23 = math.exp %22 : vector<16x128xf32>
    %cst_15 = arith.constant dense<0.000000e+00> : vector<16xf32>
    %24 = vector.multi_reduction <add>, %23, %cst_15 [1] : vector<16x128xf32> to vector<16xf32>
    %25 = vector.shape_cast %24 : vector<16xf32> to vector<16x1xf32>
    %26 = vector.broadcast %25 : vector<16x1xf32> to vector<16x128xf32>
    %27 = arith.divf %23, %26 : vector<16x128xf32>
    %c0_16 = arith.constant 0 : index
    %c0_17 = arith.constant 0 : index
    %c0_18 = arith.constant 0 : index
    %28 = vector.load %arg6[%c0_16, %c0_17, %c0_18] : memref<1x16x128xf32, #tpu.memory_space<vmem>>, vector<1x16x128xf32>
    %29 = vector.shape_cast %28 : vector<1x16x128xf32> to vector<16x128xf32>
    %30 = vector.shape_cast %27 : vector<16x128xf32> to vector<1x16x128xf32>
    tpu.vector_store %arg6[%c0_16, %c0_17, %c0_18], %30 {strides = array<i32>} : memref<1x16x128xf32, #tpu.memory_space<vmem>>, vector<1x16x128xf32>,
    return
  }
  func.func @transform_0(%arg0: i32) -> (i32, i32, i32) {
    %c0_i32 = arith.constant 0 : i32
    %c0_i32_0 = arith.constant 0 : i32
    %c0_i32_1 = arith.constant 0 : i32
    return %arg0, %c0_i32, %c0_i32_0 : i32, i32, i32
  }
  func.func @transform_1(%arg0: i32) -> (i32, i32) {
    %c0_i32 = arith.constant 0 : i32
    %c0_i32_0 = arith.constant 0 : i32
    %c0_i32_1 = arith.constant 0 : i32
    return %c0_i32, %c0_i32_0 : i32, i32
  }
  func.func @transform_2(%arg0: i32) -> (i32, i32) {
    %c0_i32 = arith.constant 0 : i32
    %c0_i32_0 = arith.constant 0 : i32
    %c0_i32_1 = arith.constant 0 : i32
    return %c0_i32, %c0_i32_0 : i32, i32
  }
  func.func @transform_3(%arg0: i32) -> (i32, i32) {
    %c0_i32 = arith.constant 0 : i32
    %c0_i32_0 = arith.constant 0 : i32
    %c0_i32_1 = arith.constant 0 : i32
    return %c0_i32, %c0_i32_0 : i32, i32
  }
  func.func @transform_4(%arg0: i32) -> (i32, i32) {
    %c0_i32 = arith.constant 0 : i32
    %c0_i32_0 = arith.constant 0 : i32
    %c0_i32_1 = arith.constant 0 : i32
    return %c0_i32, %c0_i32_0 : i32, i32
  }
  func.func @transform_5(%arg0: i32) -> (i32, i32, i32) {
    %c0_i32 = arith.constant 0 : i32
    %c0_i32_0 = arith.constant 0 : i32
    %c0_i32_1 = arith.constant 0 : i32
    return %arg0, %c0_i32, %c0_i32_0 : i32, i32, i32
  }
}

</mosaic_0001>

<bundles_post_ra>
// kernel: model_with_process_forward.1
= control target key start
LH: loop header
LB: loop body
LE: loop exit
PB: predicated region body
PF: predicated region fallthrough
CT: control target
= control target key end

     0   :  { %s1403_s18 = smov 0   ;;  %s1635_s0 = inlined_call_operand.vmem [shape: bf16[32,16,192], index: 0, kind: input, shape index: {}]   ;;  %s1636_s1 = inlined_call_operand.vmem [shape: bf16[192,128], index: 1, kind: input, shape index: {}]   ;;  %s1637_s2 = inlined_call_operand.vmem [shape: f32[1,128], index: 2, kind: input, shape index: {}]   ;;  %s1638_s3 = inlined_call_operand.vmem [shape: bf16[128,128], index: 3, kind: input, shape index: {}]   ;;  %s1639_s4 = inlined_call_operand.vmem [shape: f32[1,128], index: 4, kind: input, shape index: {}]   ;;  %s1640_s5 = inlined_call_operand.vmem [shape: f32[2,16,128], index: 5, kind: output, shape index: {}]  }
   0x1 LB: > { %s1409_s19 = sadd.s32 4294967295, %s1368_s18   ;;  %p1142_p0 = scmp.ge.s32.totalorder %s1368_s18, 1  ;;  %s1368_s18 = sphi %s1403_s18, %s15_s18  }
   0x2   : > { %p189_p1 = scmp.lt.s32.totalorder %s1368_s18, 3 }
   0x4   : > { %p190_p2 = pnand %p1142_p0, %p189_p1 }
   0x5   : > { %s1143_s22 = sshll.u32 (!%p190_p2), %s1409_s19, 4  ;;  %p225_p4 = scmp.lt.s32.totalorder (!%p190_p2), %s1409_s19, 1 }
   0x6   : > { %193 = sbr.rel (%p190_p2) target bundleno = 864 (0x360), region = 40  ;;  %p219_p3 = scmp.lt.s32.totalorder (!%p190_p2), %s1143_s22, 31 }
   0xb   : > { %v1286_v0 = vld [vmem:[%s1636_s1 + $0x38] sm:$0xff]   ;;  %v1370_v1 = vmov 0   ;;  %v1287_v2 = vld [vmem:[%s1636_s1 + $0x30] sm:$0xff]   ;;  %s1642_s22 = smov (!%p219_p3, %s1143_s22), 31  ;;  %v1288_v3 = vld [vmem:[%s1636_s1 + $0x28] sm:$0xff]   ;;  %vm510_vm0 = vcmask 523264  }
   0xc   : > { %559 = vmatprep.subr.bf16.mxu0 %v1370_v1  ;;  %1251 = vmatprep.subr.bf16.mxu1 %v1370_v1  ;;  %s1220_s27 = sshll.u32 %s1642_s22, 4  ;;  %v1289_v4 = vld [vmem:[%s1636_s1 + $0x20] sm:$0xff]   ;;  %v1290_v6 = vld [vmem:[%s1636_s1 + $0x18] sm:$0xff]   ;;  %v1291_v8 = vld [vmem:[%s1636_s1 + $0x10] sm:$0xff]   ;;  %v1371_v46 = vmov 0.0   ;;  %vm1372_vm1 = vmmov 0  }
   0xd   : > { %560 = vmatpush1.bf16.msra.mxu0 %v1286_v0  ;;  %1263 = vmatpush1.bf16.msra.mxu1 %v1286_v0  ;;  %s1435_s7 = scalar_lea.vmem %s1635_s0, %s1220_s27  ;;  %v1292_v9 = vld [vmem:[%s1636_s1 + $0x8] sm:$0xff]   ;;  %v1293_v10 = vld [vmem:[%s1636_s1] sm:$0xff]   ;;  %v1294_v11 = vld [vmem:[%s1636_s1 + $0x58] sm:$0xff]   ;;  %vm951_vm2 = vcmask 1041409   ;;  %vm953_vm3 = vcmask 1042434   ;;  %vm955_vm4 = vcmask 1043459  }
   0xe   : > { %561 = vmatprep.subr.bf16.mxu0 %v1370_v1  ;;  %1252 = vmatprep.subr.bf16.mxu1 %v1370_v1  ;;  %v1300_v5 = vld [vmem:[%s1435_s7 + $0x4] ss:$8 sps:$4 sm:$0xff]   ;;  %v1306_v7 = vld [vmem:[%s1435_s7 + $0x94] ss:$8 sps:$4 sm:$0xff]   ;;  %v1298_v15 = vld [vmem:[%s1435_s7] ss:$8 sps:$4 sm:$0xff]  }
   0xf   : > { %1193 = vmatprep.mubr.msk.bf16.mxu0 %vm510_vm0, %v1300_v5  ;;  %1202 = vmatprep.mubr.msk.bf16.mxu1 %vm510_vm0, %v1306_v7  ;;  %v1295_v12 = vld [vmem:[%s1636_s1 + $0x50] sm:$0xff]   ;;  %v1296_v13 = vld [vmem:[%s1636_s1 + $0x48] sm:$0xff]   ;;  %v1297_v14 = vld [vmem:[%s1636_s1 + $0x40] sm:$0xff]   ;;  %vm957_vm5 = vcmask 1044484   ;;  %vm959_vm6 = vcmask 1045509   ;;  %vm961_vm7 = vcmask 1046534  }
  0x10   : > { %v1304_v16 = vld [vmem:[%s1435_s7 + $0x90] ss:$8 sps:$4 sm:$0xff]   ;;  %v1301_v17 = vld [vmem:[%s1435_s7 + $0x14] ss:$8 sps:$4 sm:$0xff]   ;;  %v1310_v18 = vld [vmem:[%s1435_s7 + $0xa4] ss:$8 sps:$4 sm:$0xff]  }
  0x11   : > { %562 = vmatpush1.bf16.msra.mxu0 %v1287_v2  ;;  %1264 = vmatpush1.bf16.msra.mxu1 %v1287_v2  ;;  %v1303_v19 = vld [vmem:[%s1435_s7 + $0x10] ss:$8 sps:$4 sm:$0xff]   ;;  %v1312_v20 = vld [vmem:[%s1435_s7 + $0xa0] ss:$8 sps:$4 sm:$0xff]   ;;  %v1307_v21 = vld [vmem:[%s1435_s7 + $0x24] ss:$8 sps:$4 sm:$0xff]  }
  0x12   : > { %563 = vmatprep.subr.bf16.mxu0 %v1370_v1  ;;  %1253 = vmatprep.subr.bf16.mxu1 %v1370_v1  ;;  %v1316_v22 = vld [vmem:[%s1435_s7 + $0xb4] ss:$8 sps:$4 sm:$0xff]   ;;  %v1309_v23 = vld [vmem:[%s1435_s7 + $0x20] ss:$8 sps:$4 sm:$0xff]   ;;  %v1318_v24 = vld [vmem:[%s1435_s7 + $0xb0] ss:$8 sps:$4 sm:$0xff]  }
  0x13   : > { %v1313_v25 = vld [vmem:[%s1435_s7 + $0x34] ss:$8 sps:$4 sm:$0xff]   ;;  %v1322_v26 = vld [vmem:[%s1435_s7 + $0xc4] ss:$8 sps:$4 sm:$0xff]   ;;  %v1315_v27 = vld [vmem:[%s1435_s7 + $0x30] ss:$8 sps:$4 sm:$0xff]  }
  0x14   : > { %v1324_v28 = vld [vmem:[%s1435_s7 + $0xc0] ss:$8 sps:$4 sm:$0xff]   ;;  %v1319_v29 = vld [vmem:[%s1435_s7 + $0x44] ss:$8 sps:$4 sm:$0xff]   ;;  %v1328_v30 = vld [vmem:[%s1435_s7 + $0xd4] ss:$8 sps:$4 sm:$0xff]  }
  0x15   : > { %564 = vmatpush1.bf16.msra.mxu0 %v1288_v3  ;;  %1265 = vmatpush1.bf16.msra.mxu1 %v1288_v3  ;;  %v1321_v31 = vld [vmem:[%s1435_s7 + $0x40] ss:$8 sps:$4 sm:$0xff]   ;;  %v1330_v32 = vld [vmem:[%s1435_s7 + $0xd0] ss:$8 sps:$4 sm:$0xff]   ;;  %v1325_v33 = vld [vmem:[%s1435_s7 + $0x54] ss:$8 sps:$4 sm:$0xff]  }
  0x16   : > { %565 = vmatprep.subr.bf16.mxu0 %v1370_v1  ;;  %1254 = vmatprep.subr.bf16.mxu1 %v1370_v1  ;;  %v1334_v34 = vld [vmem:[%s1435_s7 + $0xe4] ss:$8 sps:$4 sm:$0xff]   ;;  %v1327_v35 = vld [vmem:[%s1435_s7 + $0x50] ss:$8 sps:$4 sm:$0xff]   ;;  %v1336_v36 = vld [vmem:[%s1435_s7 + $0xe0] ss:$8 sps:$4 sm:$0xff]  }
  0x17   : > { %v1331_v37 = vld [vmem:[%s1435_s7 + $0x64] ss:$8 sps:$4 sm:$0xff]   ;;  %v1340_v38 = vld [vmem:[%s1435_s7 + $0xf4] ss:$8 sps:$4 sm:$0xff]   ;;  %v1333_v39 = vld [vmem:[%s1435_s7 + $0x60] ss:$8 sps:$4 sm:$0xff]  }
  0x18   : > { %v1342_v40 = vld [vmem:[%s1435_s7 + $0xf0] ss:$8 sps:$4 sm:$0xff]   ;;  %v1337_v41 = vld [vmem:[%s1435_s7 + $0x74] ss:$8 sps:$4 sm:$0xff]   ;;  %v1343_v43 = vld [vmem:[%s1435_s7 + $0x84] ss:$8 sps:$4 sm:$0xff]  }
  0x19   : > { %566 = vmatpush1.bf16.msra.mxu0 %v1289_v4  ;;  %1266 = vmatpush1.bf16.msra.mxu1 %v1289_v4  ;;  %v1339_v42 = vld [vmem:[%s1435_s7 + $0x70] ss:$8 sps:$4 sm:$0xff]   ;;  %v1345_v44 = vld [vmem:[%s1435_s7 + $0x80] ss:$8 sps:$4 sm:$0xff]   ;;  %vm963_vm8 = vcmask 1047559   ;;  %s1644_s19 = smov (!%p225_p4, %s1409_s19), 1 }
  0x1a   : > { %567 = vmatprep.subr.bf16.mxu0 %v1370_v1  ;;  %1255 = vmatprep.subr.bf16.mxu1 %v1370_v1  ;;  %v1346_v45 = vld [vmem:[%s1638_s3 + $0x38] sm:$0xff]   ;;  %v1347_v47 = vld [vmem:[%s1638_s3 + $0x30] sm:$0xff]   ;;  %v1348_v48 = vld [vmem:[%s1638_s3 + $0x28] sm:$0xff]   ;;  %s1221_s23 = sshll.u32 %s1644_s19, 4 }
  0x1b   : > { %v1349_v49 = vld [vmem:[%s1638_s3 + $0x20] sm:$0xff]   ;;  %v1350_v50 = vld [vmem:[%s1638_s3 + $0x18] sm:$0xff]   ;;  %v1351_v51 = vld [vmem:[%s1638_s3 + $0x10] sm:$0xff]   ;;  %s229_s26 = scalar_lea.vmem %s1640_s5, %s1221_s23 }
  0x1c   : > { %v1352_v52 = vld [vmem:[%s1638_s3 + $0x8] sm:$0xff]   ;;  %v1353_v53 = vld [vmem:[%s1638_s3] sm:$0xff]  }
  0x1d   : > { %568 = vmatpush1.bf16.msra.mxu0 %v1290_v6  ;;  %1267 = vmatpush1.bf16.msra.mxu1 %v1290_v6  ;;  %v1554_v54 = vld [vmem:[%s1637_s2] ss:$0 sm:$0xff] }
  0x1e   : > { %569 = vmatprep.subr.bf16.mxu0 %v1370_v1  ;;  %1256 = vmatprep.subr.bf16.mxu1 %v1370_v1 }
  0x21   : > { %570 = vmatpush1.bf16.msra.mxu0 %v1291_v8  ;;  %1268 = vmatpush1.bf16.msra.mxu1 %v1291_v8 }
  0x22   : > { %571 = vmatprep.subr.bf16.mxu0 %v1370_v1  ;;  %1257 = vmatprep.subr.bf16.mxu1 %v1370_v1 }
  0x25   : > { %572 = vmatpush1.bf16.msra.mxu0 %v1292_v9  ;;  %1269 = vmatpush1.bf16.msra.mxu1 %v1292_v9 }
  0x26   : > { %573 = vmatprep.subr.bf16.mxu0 %v1370_v1  ;;  %1258 = vmatprep.subr.bf16.mxu1 %v1370_v1 }
  0x29   : > { %574 = vmatpush1.bf16.msra.mxu0 %v1293_v10  ;;  %1270 = vmatpush1.bf16.msra.mxu1 %v1293_v10 }
  0x2a   : > { %583 = vmatprep.subr.bf16.mxu0 %v1370_v1  ;;  %1259 = vmatprep.subr.bf16.mxu1 %v1370_v1 }
  0x2d   : > { %584 = vmatpush2.bf16.msra.mxu0 %v1294_v11  ;;  %1271 = vmatpush2.bf16.msra.mxu1 %v1294_v11 }
  0x2e   : > { %585 = vmatprep.subr.bf16.mxu0 %v1370_v1  ;;  %1260 = vmatprep.subr.bf16.mxu1 %v1370_v1 }
  0x31   : > { %586 = vmatpush2.bf16.msra.mxu0 %v1295_v12  ;;  %1272 = vmatpush2.bf16.msra.mxu1 %v1295_v12 }
  0x32   : > { %587 = vmatprep.subr.bf16.mxu0 %v1370_v1  ;;  %1261 = vmatprep.subr.bf16.mxu1 %v1370_v1 }
  0x35   : > { %588 = vmatpush2.bf16.msra.mxu0 %v1296_v13  ;;  %1273 = vmatpush2.bf16.msra.mxu1 %v1296_v13 }
  0x36   : > { %589 = vmatprep.subr.bf16.mxu0 %v1370_v1  ;;  %1262 = vmatprep.subr.bf16.mxu1 %v1370_v1 }
  0x39   : > { %590 = vmatpush2.bf16.msra.mxu0 %v1297_v14  ;;  %1274 = vmatpush2.bf16.msra.mxu1 %v1297_v14 }
  0x3a   : > { %1231 = vmatprep.subr.bf16.mxu1 %v1371_v46 }
  0x3c   : > { %592 = vmatmul.mubr.bf16.vlgmr.msra.gmra.mxu0 %v1298_v15  ;;  %664 = vmatmul.mubr.bf16.vlgmr.msra.gmra.mxu1 %v1304_v16 }
  0x3d   : > { %1194 = vmatprep.mubr.msk.bf16.mxu0 %vm510_vm0, %v1301_v17  ;;  %1203 = vmatprep.mubr.msk.bf16.mxu1 %vm510_vm0, %v1310_v18 }
  0x3e   : > { %1232 = vmatpush3.bf16.msra.mxu1 %v1346_v45 }
  0x3f   : > { %1233 = vmatprep.subr.bf16.mxu1 %v1371_v46 }
  0x42   : > { %1234 = vmatpush3.bf16.msra.mxu1 %v1347_v47 }
  0x43   : > { %1235 = vmatprep.subr.bf16.mxu1 %v1371_v46 }
  0x44   : > { %600 = vmatmul.mubr.bf16.gmra.mxu0 %v1303_v19  ;;  %672 = vmatmul.mubr.bf16.gmra.mxu1 %v1312_v20 }
  0x45   : > { %1195 = vmatprep.mubr.msk.bf16.mxu0 %vm510_vm0, %v1307_v21  ;;  %1204 = vmatprep.mubr.msk.bf16.mxu1 %vm510_vm0, %v1316_v22 }
  0x46   : > { %1236 = vmatpush3.bf16.msra.mxu1 %v1348_v48 }
  0x47   : > { %1237 = vmatprep.subr.bf16.mxu1 %v1371_v46 }
  0x4a   : > { %1238 = vmatpush3.bf16.msra.mxu1 %v1349_v49 }
  0x4b   : > { %1239 = vmatprep.subr.bf16.mxu1 %v1371_v46 }
  0x4c   : > { %608 = vmatmul.mubr.bf16.gmra.mxu0 %v1309_v23  ;;  %680 = vmatmul.mubr.bf16.gmra.mxu1 %v1318_v24 }
  0x4d   : > { %1196 = vmatprep.mubr.msk.bf16.mxu0 %vm510_vm0, %v1313_v25  ;;  %1205 = vmatprep.mubr.msk.bf16.mxu1 %vm510_vm0, %v1322_v26 }
  0x4e   : > { %1240 = vmatpush3.bf16.msra.mxu1 %v1350_v50 }
  0x4f   : > { %1241 = vmatprep.subr.bf16.mxu1 %v1371_v46 }
  0x52   : > { %1242 = vmatpush3.bf16.msra.mxu1 %v1351_v51 }
  0x53   : > { %1243 = vmatprep.subr.bf16.mxu1 %v1371_v46 }
  0x54   : > { %616 = vmatmul.mubr.bf16.gmra.mxu0 %v1315_v27  ;;  %688 = vmatmul.mubr.bf16.gmra.mxu1 %v1324_v28 }
  0x55   : > { %1197 = vmatprep.mubr.msk.bf16.mxu0 %vm510_vm0, %v1319_v29  ;;  %1206 = vmatprep.mubr.msk.bf16.mxu1 %vm510_vm0, %v1328_v30 }
  0x56   : > { %1244 = vmatpush3.bf16.msra.mxu1 %v1352_v52 }
  0x57   : > { %1245 = vmatprep.subr.bf16.mxu1 %v1371_v46 }
  0x5a   : > { %1246 = vmatpush3.bf16.msra.mxu1 %v1353_v53 }
  0x5c   : > { %624 = vmatmul.mubr.bf16.gmra.mxu0 %v1321_v31  ;;  %696 = vmatmul.mubr.bf16.gmra.mxu1 %v1330_v32 }
  0x5d   : > { %1198 = vmatprep.mubr.msk.bf16.mxu0 %vm510_vm0, %v1325_v33  ;;  %1207 = vmatprep.mubr.msk.bf16.mxu1 %vm510_vm0, %v1334_v34 }
  0x64   : > { %632 = vmatmul.mubr.bf16.gmra.mxu0 %v1327_v35  ;;  %704 = vmatmul.mubr.bf16.gmra.mxu1 %v1336_v36 }
  0x65   : > { %1199 = vmatprep.mubr.msk.bf16.mxu0 %vm510_vm0, %v1331_v37  ;;  %1208 = vmatprep.mubr.msk.bf16.mxu1 %vm510_vm0, %v1340_v38 }
  0x6c   : > { %640 = vmatmul.mubr.bf16.gmra.mxu0 %v1333_v39  ;;  %712 = vmatmul.mubr.bf16.gmra.mxu1 %v1342_v40 }
  0x6d   : > { %1200 = vmatprep.mubr.msk.bf16.mxu0 %vm510_vm0, %v1337_v41  ;;  %1247 = vmatprep.mubr.msk.bf16.mxu1 %vm1372_vm1, %v1371_v46 }
  0x74   : > { %648 = vmatmul.mubr.bf16.gmra.mxu0 %v1339_v42 }
  0x75   : > { %1201 = vmatprep.mubr.msk.bf16.mxu0 %vm510_vm0, %v1343_v43 }
  0x7c   : > { %656 = vmatmul.mubr.bf16.gmra.mxu0 %v1345_v44 }
  0xfc   : > { %v593_v55 = vpop.f32.mrf.mxu0  ;;  %v665_v56 = vpop.f32.mrf.mxu1 }
  0xfd   : > { %v666_v57 = vadd.f32 %v1554_v54, %v665_v56  ;;  %v594_v60 = vadd.f32 %v1554_v54, %v593_v55 }
  0xfe   : > { %v595_v58 = vpop.f32.mrf.mxu0  ;;  %v667_v59 = vpop.f32.mrf.mxu1 }
  0xff   : > { %v738_v0 = vmax.f32 %v666_v57, 0.0  ;;  %v720_v4 = vmax.f32 %v594_v60, 0.0 }
 0x100   : > { %v596_v61 = vpop.f32.mrf.mxu0  ;;  %v668_v62 = vpop.f32.mrf.mxu1 }
 0x101   : > { %v597_v63 = vadd.f32 %v1554_v54, %v596_v61  ;;  %v669_v1 = vadd.f32 %v1554_v54, %v668_v62 }
 0x102   : > { %v598_v2 = vpop.f32.mrf.mxu0  ;;  %v670_v3 = vpop.f32.mrf.mxu1 }
 0x103   : > { %v721_v5 = vmax.f32 %v597_v63, 0.0  ;;  %v739_v6 = vmax.f32 %v669_v1, 0.0 }
 0x104   : > { %v601_v7 = vpop.f32.mrf.mxu0  ;;  %v673_v8 = vpop.f32.mrf.mxu1 }
 0x105   : > { %v752_v9 = vadd.f32 %v721_v5, %v720_v4  ;;  %v815_v10 = vadd.f32 %v739_v6, %v738_v0  ;;  %v602_v45 = vadd.f32 %v1554_v54, %v601_v7  ;;  %v674_v48 = vadd.f32 %v1554_v54, %v673_v8 }
 0x106   : > { %v603_v11 = vpop.f32.mrf.mxu0  ;;  %v675_v12 = vpop.f32.mrf.mxu1 }
 0x107   : > { %v753_v33 = vrot.slane %v752_v9, 4  ;;  %v816_v39 = vrot.slane %v815_v10, 4  ;;  %v722_v59 = vmax.f32 %v602_v45, 0.0  ;;  %v740_v63 = vmax.f32 %v674_v48, 0.0 }
 0x108   : > { %v604_v13 = vpop.f32.mrf.mxu0  ;;  %v676_v14 = vpop.f32.mrf.mxu1 }
 0x109   : > { %v754_v38 = vadd.f32 %v753_v33, %v752_v9  ;;  %v605_v42 = vadd.f32 %v1554_v54, %v604_v13  ;;  %v817_v47 = vadd.f32 %v816_v39, %v815_v10  ;;  %v677_v49 = vadd.f32 %v1554_v54, %v676_v14 }
 0x10a   : > { %v606_v15 = vpop.f32.mrf.mxu0  ;;  %v678_v16 = vpop.f32.mrf.mxu1 }
 0x10b   : > { %v755_v46 = vrot.slane %v754_v38, 2  ;;  %v723_v52 = vmax.f32 %v605_v42, 0.0  ;;  %v818_v62 = vrot.slane %v817_v47, 2  ;;  %v741_v0 = vmax.f32 %v677_v49, 0.0 }
 0x10c   : > { %v609_v17 = vpop.f32.mrf.mxu0  ;;  %v681_v18 = vpop.f32.mrf.mxu1 }
 0x10d   : > { %v682_v55 = vadd.f32 %v1554_v54, %v681_v18  ;;  %v610_v60 = vadd.f32 %v1554_v54, %v609_v17  ;;  %v1568_v61 = vadd.f32 %v755_v46, %v754_v38  ;;  %v1570_v3 = vadd.f32 %v723_v52, %v722_v59 }
 0x10e   : > { %v611_v19 = vpop.f32.mrf.mxu0  ;;  %v683_v20 = vpop.f32.mrf.mxu1  ;;  %v819_v13 = vadd.f32 %v818_v62, %v817_v47  ;;  %v1575_v14 = vadd.f32 %v741_v0, %v740_v63 }
 0x10f   : > { %v742_v6 = vmax.f32 %v682_v55, 0.0  ;;  %v724_v10 = vmax.f32 %v610_v60, 0.0  ;;  %v757_v12 = vrot.slane %v1568_v61, 1  ;;  %v760_v18 = vrot.slane %v1570_v3, 4 }
 0x110   : > { %v612_v21 = vpop.f32.mrf.mxu0  ;;  %v684_v22 = vpop.f32.mrf.mxu1 }
 0x111   : > { %v613_v53 = vadd.f32 %v1554_v54, %v612_v21  ;;  %v685_v56 = vadd.f32 %v1554_v54, %v684_v22 }
 0x112   : > { %v614_v23 = vpop.f32.mrf.mxu0  ;;  %v686_v24 = vpop.f32.mrf.mxu1 }
 0x113   : > { %v725_v4 = vmax.f32 %v613_v53, 0.0  ;;  %v743_v7 = vmax.f32 %v685_v56, 0.0 }
 0x114   : > { %v617_v25 = vpop.f32.mrf.mxu0  ;;  %v689_v26 = vpop.f32.mrf.mxu1 }
 0x115   : > { %v618_v11 = vadd.f32 %v1554_v54, %v617_v25  ;;  %v766_v19 = vadd.f32 %v725_v4, %v724_v10  ;;  %v690_v20 = vadd.f32 %v1554_v54, %v689_v26  ;;  %v1582_v24 = vadd.f32 %v743_v7, %v742_v6 }
 0x116   : > { %v619_v27 = vpop.f32.mrf.mxu0  ;;  %v691_v28 = vpop.f32.mrf.mxu1  ;;  %v823_v6 = vrot.slane %v1575_v14, 4 }
 0x117   : > { %v767_v63 = vrot.slane %v766_v19, 4  ;;  %v830_v10 = vrot.slane %v1582_v24, 4 }
 0x118   : > { %v620_v29 = vpop.f32.mrf.mxu0  ;;  %v692_v30 = vpop.f32.mrf.mxu1 }
 0x119   : > { %v621_v5 = vadd.f32 %v1554_v54, %v620_v29  ;;  %v693_v25 = vadd.f32 %v1554_v54, %v692_v30  ;;  %v726_v29 = vmax.f32 %v618_v11, 0.0 }
 0x11a   : > { %v622_v31 = vpop.f32.mrf.mxu0  ;;  %v694_v32 = vpop.f32.mrf.mxu1 }
 0x11b   : > { %v727_v22 = vmax.f32 %v621_v5, 0.0  ;;  %v758_v5 = vadd.f32 %v757_v12, %v1568_v61 }
 0x11c   : > { %v625_v34 = vpop.f32.mrf.mxu0  ;;  %v697_v35 = vpop.f32.mrf.mxu1 }
 0x11d   : > { %v626_v23 = vadd.f32 %v1554_v54, %v625_v34  ;;  %v698_v32 = vadd.f32 %v1554_v54, %v697_v35  ;;  %v745_v35 = vmax.f32 %v693_v25, 0.0 }
 0x11e   : > { %v627_v36 = vpop.f32.mrf.mxu0  ;;  %v699_v37 = vpop.f32.mrf.mxu1 }
 0x11f   : > { %v728_v45 = vmax.f32 %v626_v23, 0.0  ;;  %v746_v49 = vmax.f32 %v698_v32, 0.0  ;;  %v768_v23 = vadd.f32 %v767_v63, %v766_v19  ;;  %v831_v32 = vadd.f32 %v830_v10, %v1582_v24 }
 0x120   : > { %v628_v40 = vpop.f32.mrf.mxu0  ;;  %v700_v41 = vpop.f32.mrf.mxu1 }
 0x121   : > { %v629_v15 = vadd.f32 %v1554_v54, %v628_v40  ;;  %v701_v33 = vadd.f32 %v1554_v54, %v700_v41  ;;  %v744_v40 = vmax.f32 %v690_v20, 0.0  ;;  %v832_v24 = vrot.slane %v831_v32, 2 }
 0x122   : > { %v630_v43 = vpop.f32.mrf.mxu0  ;;  %v702_v44 = vpop.f32.mrf.mxu1 }
 0x123   : > { %v729_v36 = vmax.f32 %v629_v15, 0.0  ;;  %v773_v44 = vadd.f32 %v727_v22, %v726_v29 }
 0x124   : > { %v633_v50 = vpop.f32.mrf.mxu0  ;;  %v705_v51 = vpop.f32.mrf.mxu1 }
 0x125   : > { %v634_v31 = vadd.f32 %v1554_v54, %v633_v50  ;;  %v706_v38 = vadd.f32 %v1554_v54, %v705_v51  ;;  %v747_v50 = vmax.f32 %v701_v33, 0.0  ;;  %v780_v52 = vadd.f32 %v729_v36, %v728_v45 }
 0x126   : > { %v635_v57 = vpop.f32.mrf.mxu0  ;;  %v707_v58 = vpop.f32.mrf.mxu1  ;;  %v774_v0 = vrot.slane %v773_v44, 4 }
 0x127   : > { %v730_v48 = vmax.f32 %v634_v31, 0.0  ;;  %v748_v55 = vmax.f32 %v706_v38, 0.0  ;;  %v820_v58 = vrot.slane %v819_v13, 1  ;;  %v843_v7 = vadd.f32 %v747_v50, %v746_v49 }
 0x128   : > { %v636_v1 = vpop.f32.mrf.mxu0  ;;  %v708_v2 = vpop.f32.mrf.mxu1  ;;  %v781_v11 = vrot.slane %v780_v52, 4  ;;  %v775_v25 = vadd.f32 %v774_v0, %v773_v44 }
 0x129   : > { %v637_v21 = vadd.f32 %v1554_v54, %v636_v1  ;;  %v709_v34 = vadd.f32 %v1554_v54, %v708_v2  ;;  %v836_v1 = vadd.f32 %v745_v35, %v744_v40  ;;  %v844_v29 = vrot.slane %v843_v7, 4 }
 0x12a   : > { %v638_v8 = vpop.f32.mrf.mxu0  ;;  %v710_v9 = vpop.f32.mrf.mxu1  ;;  %v782_v33 = vadd.f32 %v781_v11, %v780_v52 }
 0x12b   : > { %v731_v30 = vmax.f32 %v637_v21, 0.0  ;;  %v749_v57 = vmax.f32 %v709_v34, 0.0  ;;  %v761_v9 = vadd.f32 %v760_v18, %v1570_v3  ;;  %v837_v61 = vrot.slane %v836_v1, 4 }
 0x12c   : > { %v641_v16 = vpop.f32.mrf.mxu0  ;;  %v713_v17 = vpop.f32.mrf.mxu1  ;;  %v769_v34 = vrot.slane %v768_v23, 2 }
 0x12d   : > { %v642_v26 = vadd.f32 %v1554_v54, %v641_v16  ;;  %v714_v43 = vadd.f32 %v1554_v54, %v713_v17  ;;  %v787_v59 = vadd.f32 %v731_v30, %v730_v48  ;;  %v850_v15 = vadd.f32 %v749_v57, %v748_v55 }
 0x12e   : > { %v643_v27 = vpop.f32.mrf.mxu0  ;;  %v715_v28 = vpop.f32.mrf.mxu1  ;;  %v821_v17 = vadd.f32 %v820_v58, %v819_v13  ;;  %v762_v18 = vrot.slane %v761_v9, 2  ;;  %v838_v40 = vadd.f32 %v837_v61, %v836_v1  ;;  %v770_v52 = vadd.f32 %v769_v34, %v768_v23 }
 0x12f   : > { %v732_v53 = vmax.f32 %v642_v26, 0.0  ;;  %v750_v60 = vmax.f32 %v714_v43, 0.0  ;;  %v788_v20 = vrot.slane %v787_v59, 4  ;;  %v824_v28 = vadd.f32 %v823_v6, %v1575_v14 }
 0x130   : > { %v644_v37 = vpop.f32.mrf.mxu0  ;;  %v716_v39 = vpop.f32.mrf.mxu1  ;;  %v851_v36 = vrot.slane %v850_v15, 4  ;;  %v1602_v26 = vmul.f32 0.00390625, %v758_v5  ;;  %v845_v43 = vadd.f32 %v844_v29, %v843_v7  ;;  %v763_v35 = vadd.f32 %v762_v18, %v761_v9 }
 0x131   : > { %v645_v42 = vadd.f32 %v1554_v54, %v644_v37  ;;  %v717_v41 = vadd.f32 %v1554_v54, %v716_v39  ;;  %v789_v37 = vadd.f32 %v788_v20, %v787_v59  ;;  %v776_v39 = vrot.slane %v775_v25, 2 }
 0x132   : > { %v646_v46 = vpop.f32.mrf.mxu0  ;;  %v718_v47 = vpop.f32.mrf.mxu1  ;;  %v825_v14 = vrot.slane %v824_v28, 2  ;;  %v839_v55 = vrot.slane %v838_v40, 2  ;;  %v846_v58 = vrot.slane %v845_v43, 2  ;;  %v764_v63 = vrot.slane %v763_v35, 1 }
 0x133   : > { %v733_v51 = vmax.f32 %v645_v42, 0.0  ;;  %v751_v62 = vmax.f32 %v717_v41, 0.0  ;;  %v783_v46 = vrot.slane %v782_v33, 2  ;;  %v852_v41 = vadd.f32 %v851_v36, %v850_v15 }
 0x134   : > { %v649_v56 = vpop.f32.mrf.mxu0  ;;  %v790_v48 = vrot.slane %v789_v37, 2  ;;  %v826_v0 = vadd.f32 %v825_v14, %v824_v28  ;;  %v840_v9 = vadd.f32 %v839_v55, %v838_v40  ;;  %v847_v15 = vadd.f32 %v846_v58, %v845_v43 }
 0x135   : > { %v794_v2 = vadd.f32 %v733_v51, %v732_v53  ;;  %v650_v8 = vadd.f32 %v1554_v54, %v649_v56  ;;  %v857_v22 = vadd.f32 %v751_v62, %v750_v60  ;;  %v777_v53 = vadd.f32 %v776_v39, %v775_v25 }
 0x136   : > { %v651_v4 = vpop.f32.mrf.mxu0  ;;  %v784_v1 = vadd.f32 %v783_v46, %v782_v33  ;;  %v791_v5 = vadd.f32 %v790_v48, %v789_v37  ;;  %v880_v29 = vpack.c.bf16 %v1602_v26, %v1602_v26 }
 0x137   : > { %v795_v12 = vrot.slane %v794_v2, 4  ;;  %v734_v31 = vmax.f32 %v650_v8, 0.0  ;;  %v858_v19 = vrot.slane %v857_v22, 4  ;;  %v833_v4 = vadd.f32 %v832_v24, %v831_v32 }
 0x138   : > { %v652_v16 = vpop.f32.mrf.mxu0  ;;  %v1606_v8 = vmul.f32 0.00390625, %v821_v17  ;;  %v778_v11 = vrot.slane %v777_v53, 1  ;;  %v785_v23 = vrot.slane %v784_v1, 1  ;;  %v848_v32 = vrot.slane %v847_v15, 1 }
 0x139   : > { %v653_v21 = vadd.f32 %v1554_v54, %v652_v16  ;;  %v796_v30 = vadd.f32 %v795_v12, %v794_v2  ;;  %v859_v50 = vadd.f32 %v858_v19, %v857_v22  ;;  %v853_v2 = vrot.slane %v852_v41, 2 }
 0x13a   : > { %v654_v27 = vpop.f32.mrf.mxu0  ;;  %v827_v22 = vrot.slane %v826_v0, 1  ;;  %v834_v61 = vrot.slane %v833_v4, 1  ;;  %v792_v12 = vrot.slane %v791_v5, 1  ;;  %v779_v18 = vadd.f32 %v778_v11, %v777_v53 }
 0x13b   : > { %v735_v3 = vmax.f32 %v653_v21, 0.0  ;;  %v797_v56 = vrot.slane %v796_v30, 2  ;;  %v860_v6 = vrot.slane %v859_v50, 2  ;;  %v765_v21 = vadd.f32 %v764_v63, %v763_v35 }
 0x13c   : > { %v657_v13 = vpop.f32.mrf.mxu0  ;;  %v854_v25 = vadd.f32 %v853_v2, %v852_v41  ;;  %v828_v37 = vadd.f32 %v827_v22, %v826_v0  ;;  %v835_v34 = vadd.f32 %v834_v61, %v833_v4  ;;  %v793_v39 = vadd.f32 %v792_v12, %v791_v5 }
 0x13d   : > { %v801_v38 = vadd.f32 %v735_v3, %v734_v31  ;;  %v658_v45 = vadd.f32 %v1554_v54, %v657_v13  ;;  %v798_v10 = vadd.f32 %v797_v56, %v796_v30  ;;  %v861_v27 = vadd.f32 %v860_v6, %v859_v50 }
 0x13e   : > { %v659_v42 = vpop.f32.mrf.mxu0  ;;  %v841_v31 = vrot.slane %v840_v9, 1  ;;  %v865_v13 = vmul.f32 0.00390625, %v765_v21  ;;  %v855_v19 = vrot.slane %v854_v25, 1  ;;  %v874_v41 = vmul.f32 0.00390625, %v828_v37 }
 0x13f   : > { %v802_v44 = vrot.slane %v801_v38, 4  ;;  %v736_v60 = vmax.f32 %v658_v45, 0.0  ;;  %v799_v3 = vrot.slane %v798_v10, 1  ;;  %v862_v40 = vrot.slane %v861_v27, 1 }
 0x140   : > { %v660_v47 = vpop.f32.mrf.mxu0  ;;  %v889_v42 = vpack.c.bf16 %v1606_v8, %v1606_v8  ;;  %v842_v14 = vadd.f32 %v841_v31, %v840_v9  ;;  %v849_v45 = vadd.f32 %v848_v32, %v847_v15  ;;  %v881_v46 = vpack.c.bf16 %v865_v13, %v865_v13 }
 0x141   : > { %v803_v49 = vadd.f32 %v802_v44, %v801_v38  ;;  %v661_v51 = vadd.f32 %v1554_v54, %v660_v47  ;;  %v771_v54 = vrot.slane %v770_v52, 1  ;;  %v786_v38 = vadd.f32 %v785_v23, %v784_v1 }
 0x142   : > { %v662_v57 = vpop.f32.mrf.mxu0  ;;  %v800_v43 = vadd.f32 %v799_v3, %v798_v10  ;;  %v867_v44 = vmul.f32 0.00390625, %v779_v18  ;;  %v856_v48 = vadd.f32 %v855_v19, %v854_v25  ;;  %v869_v50 = vmul.f32 0.00390625, %v793_v39 }
 0x143   : > { %v804_v59 = vrot.slane %v803_v49, 2  ;;  %v737_v62 = vmax.f32 %v661_v51, 0.0  ;;  %v772_v17 = vadd.f32 %v771_v54, %v770_v52  ;;  %v868_v47 = vmul.f32 0.00390625, %v786_v38 }
 0x144   : > { %v863_v51 = vadd.f32 %v862_v40, %v861_v27  ;;  %v935_v53 = vunpack.c.l.b16 %v880_v29  ;;  %v876_v56 = vmul.f32 0.00390625, %v842_v14  ;;  %v870_v57 = vmul.f32 0.00390625, %v800_v43  ;;  %v1209_v43 = vld [vmem:[%s1639_s4] ss:$0 sm:$0xff] }
 0x145   : > { %v808_v7 = vadd.f32 %v737_v62, %v736_v60  ;;  %v805_v16 = vadd.f32 %v804_v59, %v803_v49  ;;  %v866_v26 = vmul.f32 0.00390625, %v772_v17  ;;  %v875_v49 = vmul.f32 0.00390625, %v835_v34 }
 0x146   : > { %v883_v58 = vpack.c.bf16 %v867_v44, %v867_v44  ;;  %v877_v59 = vmul.f32 0.00390625, %v849_v45  ;;  %v936_v63 = vunpack.c.l.b16 %v881_v46  ;;  %v890_v0 = vpack.c.bf16 %v874_v41, %v874_v41 }
 0x147   : > { %v809_v20 = vrot.slane %v808_v7, 4  ;;  %v806_v33 = vrot.slane %v805_v16, 1  ;;  %v882_v55 = vpack.c.bf16 %v866_v26, %v866_v26  ;;  %v884_v1 = vpack.c.bf16 %v868_v47, %v868_v47 }
 0x148   : > { %v878_v2 = vmul.f32 0.00390625, %v856_v48  ;;  %v891_v4 = vpack.c.bf16 %v875_v49, %v875_v49  ;;  %v885_v5 = vpack.c.bf16 %v869_v50, %v869_v50  ;;  %v879_v6 = vmul.f32 0.00390625, %v863_v51 }
 0x149   : > { %v810_v28 = vadd.f32 %v809_v20, %v808_v7  ;;  %v807_v35 = vadd.f32 %v806_v33, %v805_v16  ;;  %v944_v8 = vunpack.c.l.b16 %v889_v42  ;;  %v937_v54 = vunpack.c.l.b16 %v882_v55 }
 0x14a   : > { %v892_v9 = vpack.c.bf16 %v876_v56, %v876_v56  ;;  %v886_v10 = vpack.c.bf16 %v870_v57, %v870_v57  ;;  %v938_v11 = vunpack.c.l.b16 %v883_v58  ;;  %v893_v15 = vpack.c.bf16 %v877_v59, %v877_v59 }
 0x14b   : > { %v811_v36 = vrot.slane %v810_v28, 2  ;;  %v871_v60 = vmul.f32 0.00390625, %v807_v35  ;;  %v952_v21 = vsel %vm951_vm2, %v936_v63, %v935_v53  ;;  %v945_v22 = vunpack.c.l.b16 %v890_v0 }
 0x14c   : > { %v939_v23 = vunpack.c.l.b16 %v884_v1  ;;  %v894_v25 = vpack.c.bf16 %v878_v2, %v878_v2  ;;  %v946_v61 = vunpack.c.l.b16 %v891_v4  ;;  %v940_v12 = vunpack.c.l.b16 %v885_v5 }
 0x14d   : > { %v812_v30 = vadd.f32 %v811_v36, %v810_v28  ;;  %v887_v16 = vpack.c.bf16 %v871_v60, %v871_v60  ;;  %v895_v27 = vpack.c.bf16 %v879_v6, %v879_v6  ;;  %v954_v29 = vsel %vm953_vm3, %v937_v54, %v952_v21 }
 0x14e   : > { %v947_v17 = vunpack.c.l.b16 %v892_v9  ;;  %v941_v31 = vunpack.c.l.b16 %v886_v10  ;;  %v956_v18 = vsel %vm955_vm4, %v938_v11, %v954_v29  ;;  %v948_v32 = vunpack.c.l.b16 %v893_v15 }
 0x14f   : > { %v813_v24 = vrot.slane %v812_v30, 1  ;;  %v942_v33 = vunpack.c.l.b16 %v887_v16  ;;  %v958_v13 = vsel %vm957_vm5, %v939_v23, %v956_v18  ;;  %v949_v37 = vunpack.c.l.b16 %v894_v25 }
 0x150   : > { %v960_v19 = vsel %vm959_vm6, %v940_v12, %v958_v13  ;;  %v950_v34 = vunpack.c.l.b16 %v895_v27 }
 0x151   : > { %v814_v52 = vadd.f32 %v813_v24, %v812_v30  ;;  %v962_v40 = vsel %vm961_vm7, %v941_v31, %v960_v19 }
 0x152   : > { %v964_v42 = vsel %vm963_vm8, %v942_v33, %v962_v40 }
 0x153   : > { %v872_v62 = vmul.f32 0.00390625, %v814_v52 }
 0x155   : > { %v888_v7 = vpack.c.bf16 %v872_v62, %v872_v62 }
 0x157   : > { %v943_v20 = vunpack.c.l.b16 %v888_v7 }
 0x159   : > { %v965_v28 = vsel %vm951_vm2, %v944_v8, %v943_v20 }
 0x15a   : > { %v966_v3 = vsel %vm953_vm3, %v945_v22, %v965_v28 }
 0x15b   : > { %v967_v36 = vsel %vm955_vm4, %v946_v61, %v966_v3 }
 0x15c   : > { %v968_v38 = vsel %vm957_vm5, %v947_v17, %v967_v36 }
 0x15d   : > { %v969_v39 = vsel %vm959_vm6, %v948_v32, %v968_v38 }
 0x15e   : > { %v970_v30 = vsel %vm961_vm7, %v949_v37, %v969_v39 }
 0x15f   : > { %v971_v26 = vsel %vm963_vm8, %v950_v34, %v970_v30 }
 0x160   : > { %v972_v14 = vpack.c.b16 %v971_v26, %v964_v42 }
 0x162   : > { %1248 = vmatmul.mubr.bf16.vlgmr.msra.gmra.mxu1 %v972_v14 }
 0x222   : > { %v1056_v44 = vpop.f32.mrf.mxu1 }
 0x223   : > { %v1057_v45 = vadd.f32 %v1209_v43, %v1056_v44 }
 0x224   : > { %v1249_v35 = vpop.f32.mrf.mxu1 }
 0x225   : > { %1063 = vmax.xlane.f32.xlu0 %v1057_v45 }
 0x226   : > { %v1059_v24 = vpop.f32.mrf.mxu1 }
 0x227   : > { %v1060_v46 = vadd.f32 %v1209_v43, %v1059_v24 }
 0x228   : > { %v1250_v41 = vpop.f32.mrf.mxu1 }
 0x229   : > { %1065 = vmax.xlane.f32.xlu0 %v1060_v46 }
 0x2ae   : > { %v1064_v47 = vpop.xlane.xlu0 %1063 }
 0x2af   : > { %v1067_v48 = vsub.f32 %v1057_v45, %v1064_v47 }
 0x2b1   : > { %v1069_v49 = vmul.f32 1.442695, %v1067_v48 }
 0x2b2   : > { %v1066_v50 = vpop.xlane.xlu0 %1065 }
 0x2b3   : > { %1354 = vpow2.f32 %v1069_v49  ;;  %v1068_v51 = vsub.f32 %v1060_v46, %v1066_v50 }
 0x2b5   : > { %v1071_v52 = vmul.f32 1.442695, %v1068_v51 }
 0x2b7   : > { %1356 = vpow2.f32 %v1071_v52 }
 0x2c0   : > { %v1355_v53 = vpop.eup %1354 }
 0x2c1   : > { %1073 = vadd.xlane.f32.xlu1 %v1355_v53 }
 0x2c4   : > { %v1357_v55 = vpop.eup %1356 }
 0x2c5   : > { %1075 = vadd.xlane.f32.xlu1 %v1357_v55 }
 0x34a   : > { %v1074_v56 = vpop.xlane.xlu1 %1073 }
 0x34b   : > { %1358 = vrcp.f32 %v1074_v56 }
 0x34e   : > { %v1076_v57 = vpop.xlane.xlu1 %1075 }
 0x34f   : > { %1360 = vrcp.f32 %v1076_v57 }
 0x358   : > { %v1359_v58 = vpop.eup %1358 }
 0x359   : > { %v1078_v59 = vmul.f32 %v1359_v58, %v1355_v53 }
 0x35b   : > { %1081 = vst [vmem:[%s229_s26] sm:$0xff] %v1078_v59 }
 0x35c   : > { %v1361_v60 = vpop.eup %1360 }
 0x35d   : > { %v1080_v62 = vmul.f32 %v1361_v60, %v1357_v55 }
 0x35f   : > { %1082 = vst [vmem:[%s229_s26 + $0x8] sm:$0xff] %v1080_v62 }
 0x360 PF: > { %s15_s18 = sadd.s32 1, %s1368_s18  }
 0x361   : > { %p12_p5 = scmp.ge.s32.totalorder %s15_s18, 4  }
 0x363   :  { %14 = sbr.rel (!%p12_p5) target bundleno = 1 (0x1), region = 70 }

</bundles_post_ra>
